<compile_context>
chip_gen: v7x
topology: tpu7x:2x2x1
jax: 0.10.0
libtpu: 0.0.40
codegen_flags: <defaults>
</compile_context>

<pallas_src>
import functools

import jax
import jax.numpy as jnp
from jax.experimental import pallas as pl
from jax.experimental.pallas import tpu as pltpu

_MIB = 1024 * 1024


def _round_up(n, m):
    return ((n + m - 1) // m) * m


@functools.lru_cache(maxsize=1)
def _vmem_capacity_bytes():
    """Per-TensorCore VMEM capacity; conservative 64 MiB if unqueryable."""
    try:
        return int(pltpu.get_tpu_info().vmem_capacity_bytes)
    except Exception:
        pass
    try:
        kind = jax.devices()[0].device_kind.lower()
        return 64 * _MIB if "v7" in kind else 128 * _MIB
    except Exception:
        return 64 * _MIB


@functools.lru_cache(maxsize=1)
def _supports_buffered_blockspec():
    """One-time probe: can BlockSpec(pipeline_mode=pl.Buffered(1)) be built and
    lowered on this jax/libtpu?  Pins the single-buffered-weights decision
    *before* block_b is sized, so VMEM accounting matches reality and we never
    silently fall back mid-flight."""
    if not hasattr(pl, "Buffered"):
        return False
    try:
        w_spec = pl.BlockSpec((8, 128), lambda i: (0, 0), pipeline_mode=pl.Buffered(1))
    except TypeError:
        return False
    try:
        def _probe(x_ref, w_ref, o_ref):
            o_ref[...] = x_ref[...] + w_ref[...]

        probe = pl.pallas_call(
            _probe,
            out_shape=jax.ShapeDtypeStruct((16, 128), jnp.float32),
            grid_spec=pl.GridSpec(
                grid=(2,),
                in_specs=[pl.BlockSpec((8, 128), lambda i: (i, 0)), w_spec],
                out_specs=pl.BlockSpec((8, 128), lambda i: (i, 0)),
            ),
        )
        jax.jit(probe).lower(
            jax.ShapeDtypeStruct((16, 128), jnp.float32),
            jax.ShapeDtypeStruct((8, 128), jnp.float32),
        ).compile()
        return True
    except Exception:
        return False


def encoder1_kernel(x_ref, w1_ref, b1_ref, w2_ref, b2_ref, w3_ref, b3_ref, o_ref):
    # Matmul operands in the weights' dtype (bf16 by default: MXU fast path and
    # half the resident weight bytes); accumulation, bias-add and ReLU stay in
    # f32 (safe elementwise path on v5e which has no bf16 VPU/EUP).
    mm_dt = w1_ref.dtype
    x = x_ref[...].astype(mm_dt)
    h1 = jnp.dot(x, w1_ref[...], preferred_element_type=jnp.float32)
    h1 = jnp.maximum(h1 + b1_ref[...], 0.0)
    h2 = jnp.dot(h1.astype(mm_dt), w2_ref[...], preferred_element_type=jnp.float32)
    h2 = jnp.maximum(h2 + b2_ref[...], 0.0)
    z = jnp.dot(h2.astype(mm_dt), w3_ref[...], preferred_element_type=jnp.float32)
    z = jnp.maximum(z + b3_ref[...], 0.0)
    o_ref[...] = z.astype(o_ref.dtype)


def _choose_block_b(B, in_size, h1, h2, latent, x_bytes, out_bytes,
                    param_bytes, weight_bufs, budget):
    # VMEM left after resident parameters (weight_bufs = 1 when Buffered(1) is
    # in effect, 2 for the default double-buffered pipeline).
    avail = budget - weight_bufs * param_bytes
    # Per-batch-row VMEM footprint of the pipelined activations.
    per_row = (2 * in_size * x_bytes          # double-buffered input tile
               + 2 * latent * out_bytes       # double-buffered output tile
               + 4 * (h1 + h2 + latent)       # f32 intermediates / results
               + 2 * (in_size + h1 + h2))     # transient bf16 matmul operands
    max_rows = avail // per_row
    if max_rows < 256:
        # TODO(synk): if even bf16 w1 alone starves per-TC VMEM (very large
        # in_size), layer 1 needs a K-tiled inner pipeline (pltpu.emit_pipeline
        # over in_size with an f32 accumulator) rather than shrinking block_b.
        max_rows = max(max_rows, 8)
    # Whole batch in one tile when it fits and isn't huge: one big DMA near
    # the HBM roofline, no per-step overhead on small batches.
    if B <= max_rows and B <= 1024:
        return B
    # Otherwise tile: prefer large multiples of 256 (fills the 256-wide MXU M
    # dim since h1/h2/latent are small, amortizes ~0.35us/step overhead, and
    # keeps >=2 grid steps so DMA/compute overlap and megacore sharding work).
    cap = min(max_rows, 1024, B)
    for mult in (256, 128, 16, 8):
        blk = (cap // mult) * mult
        if blk >= mult:
            return blk
    return min(B, 8)


def _build_call(B, block_b, in_size, latent, param_shapes, out_dtype,
                single_buffer_params, vmem_limit, cost):
    grid = (pl.cdiv(B, block_b),)

    def act_spec(dim):
        return pl.BlockSpec((block_b, dim), lambda i: (i, 0))

    def param_spec(shape):
        idx_map = lambda i, _nd=len(shape): (0,) * _nd
        if single_buffer_params:
            # Constant index_map across the grid -> a single resident buffer
            # (saves one full weight copy of VMEM vs default double buffering).
            return pl.BlockSpec(shape, idx_map, pipeline_mode=pl.Buffered(1))
        return pl.BlockSpec(shape, idx_map)

    return pl.pallas_call(
        encoder1_kernel,
        out_shape=jax.ShapeDtypeStruct((B, latent), out_dtype),
        grid_spec=pl.GridSpec(
            grid=grid,
            in_specs=[act_spec(in_size)] + [param_spec(s) for s in param_shapes],
            out_specs=act_spec(latent),
        ),
        compiler_params=pltpu.CompilerParams(
            dimension_semantics=("parallel",),
            vmem_limit_bytes=vmem_limit,
        ),
        cost_estimate=cost,
    )


def encoder1_forward(x, params, *, block_b=None):
    """x: (B, in_size), f32 or bf16.  params: transposed weights (in, out)
    (bf16 by default), biases (1, out) f32.  Returns (B, latent) in x.dtype."""
    B, in_size = x.shape
    h1 = params["w1"].shape[1]
    h2 = params["w2"].shape[1]
    latent = params["w3"].shape[1]

    x_bytes = jnp.dtype(x.dtype).itemsize
    out_dtype = x.dtype
    out_bytes = x_bytes
    w_bytes = jnp.dtype(params["w1"].dtype).itemsize
    param_bytes = ((in_size * h1 + h1 * h2 + h2 * latent) * w_bytes
                   + (h1 + h2 + latent) * 4)

    single_buffer = _supports_buffered_blockspec()
    weight_bufs = 1 if single_buffer else 2

    vmem = _vmem_capacity_bytes()
    budget = (vmem * 3) // 4                       # ~48 MiB v7x, ~96 MiB v5e/v6e
    vmem_limit = min(budget + 8 * _MIB, vmem - 4 * _MIB)

    if block_b is None:
        block_b = _choose_block_b(B, in_size, h1, h2, latent, x_bytes, out_bytes,
                                  param_bytes, weight_bufs, budget)
    elif block_b < B:
        block_b = _round_up(block_b, 16)           # bf16 vreg holds 16 sublanes
    block_b = min(block_b, B)

    cost = pl.CostEstimate(
        flops=2 * B * (in_size * h1 + h1 * h2 + h2 * latent),
        transcendentals=0,
        bytes_accessed=(B * in_size * x_bytes + param_bytes + B * latent * out_bytes),
    )

    args = (x, params["w1"], params["b1"], params["w2"], params["b2"],
            params["w3"], params["b3"])
    param_shapes = [a.shape for a in args[1:]]

    call = _build_call(B, block_b, in_size, latent, param_shapes, out_dtype,
                       single_buffer, vmem_limit, cost)
    return call(*args)


def init_params(key, in_size, latent_size, *, weight_dtype=jnp.bfloat16):
    """Shapes match Encoder1: PyTorch nn.Linear stores weight as (out, in); we
    store the transpose (in, out) so the kernel computes x @ W + b on the MXU.
    Weights default to bf16 (fast MXU path, half the resident bytes); pass
    weight_dtype=jnp.float32 to match PyTorch f32 numerics exactly."""
    h1, h2 = in_size // 2, in_size // 4
    ks = jax.random.split(key, 6)

    def uniform(k, shape, fan_in, dtype):
        bound = 1.0 / jnp.sqrt(fan_in)
        return jax.random.uniform(k, shape, jnp.float32, -bound, bound).astype(dtype)

    return {
        "w1": uniform(ks[0], (in_size, h1), in_size, weight_dtype),
        "b1": uniform(ks[1], (1, h1), in_size, jnp.float32),
        "w2": uniform(ks[2], (h1, h2), h1, weight_dtype),
        "b2": uniform(ks[3], (1, h2), h1, jnp.float32),
        "w3": uniform(ks[4], (h2, latent_size), h2, weight_dtype),
        "b3": uniform(ks[5], (1, latent_size), h2, jnp.float32),
    }


def encoder1_ref(x, p):
    """Pure-JAX reference with identical matmul-operand-dtype / f32-acc math."""
    mm_dt = p["w1"].dtype

    def lin_relu(a, w, b):
        y = jnp.dot(a.astype(mm_dt), w.astype(mm_dt),
                    preferred_element_type=jnp.float32)
        return jnp.maximum(y + b, 0.0)

    a1 = lin_relu(x, p["w1"], p["b1"])
    a2 = lin_relu(a1, p["w2"], p["b2"])
    return lin_relu(a2, p["w3"], p["b3"]).astype(x.dtype)


if __name__ == "__main__":
    key = jax.random.PRNGKey(0)
    kx, kp, kx2 = jax.random.split(key, 3)

    # Small shapes consistent with Encoder1(in_size=128, latent_size=16).
    B, IN_SIZE, LATENT = 8, 128, 16
    params = init_params(kp, IN_SIZE, LATENT)

    x = jax.random.normal(kx, (B, IN_SIZE), jnp.float32)
    z = jax.block_until_ready(encoder1_forward(x, params))
    z_ref = encoder1_ref(x, params)
    assert z.shape == (B, LATENT)
    assert jnp.allclose(z, z_ref, atol=2e-3, rtol=2e-3), float(jnp.max(jnp.abs(z - z_ref)))

    # Exercise the multi-tile (grid > 1) + ragged-last-tile path explicitly.
    B2 = 40
    x2 = jax.random.normal(kx2, (B2, IN_SIZE), jnp.float32)
    z2 = jax.block_until_ready(encoder1_forward(x2, params, block_b=16))
    z2_ref = encoder1_ref(x2, params)
    assert z2.shape == (B2, LATENT)
    assert jnp.allclose(z2, z2_ref, atol=2e-3, rtol=2e-3), float(jnp.max(jnp.abs(z2 - z2_ref)))

    # Dtype-polymorphic x: bf16 activations halve input HBM traffic.
    z3 = jax.block_until_ready(encoder1_forward(x.astype(jnp.bfloat16), params))
    assert z3.shape == (B, LATENT) and z3.dtype == jnp.bfloat16

    print("KERNEL_OK")
</pallas_src>

<mosaic_0001>
module attributes {stable_mosaic.version = 11 : i64} {
  func.func @encoder1_kernel(%arg0: i32, %arg1: memref<8x128xf32, #tpu.memory_space<vmem>>, %arg2: memref<128x64xbf16, #tpu.memory_space<vmem>>, %arg3: memref<1x64xf32, #tpu.memory_space<vmem>>, %arg4: memref<64x32xbf16, #tpu.memory_space<vmem>>, %arg5: memref<1x32xf32, #tpu.memory_space<vmem>>, %arg6: memref<32x16xbf16, #tpu.memory_space<vmem>>, %arg7: memref<1x16xf32, #tpu.memory_space<vmem>>, %arg8: memref<8x16xf32, #tpu.memory_space<vmem>>) attributes {dimension_semantics = [#tpu.dimension_semantics<parallel>], iteration_bounds = array<i64: 1>, scalar_prefetch = 0 : i64, scratch_operands = 0 : i64, tpu.core_type = #tpu.core_type<tc>, window_params = [{transform_indices = @transform_0, window_bounds = array<i64: 8, 128>}, {pipeline_mode = #tpu.pipeline_mode<synchronous>, transform_indices = @transform_1, window_bounds = array<i64: 128, 64>}, {pipeline_mode = #tpu.pipeline_mode<synchronous>, transform_indices = @transform_2, window_bounds = array<i64: 1, 64>}, {pipeline_mode = #tpu.pipeline_mode<synchronous>, transform_indices = @transform_3, window_bounds = array<i64: 64, 32>}, {pipeline_mode = #tpu.pipeline_mode<synchronous>, transform_indices = @transform_4, window_bounds = array<i64: 1, 32>}, {pipeline_mode = #tpu.pipeline_mode<synchronous>, transform_indices = @transform_5, window_bounds = array<i64: 32, 16>}, {pipeline_mode = #tpu.pipeline_mode<synchronous>, transform_indices = @transform_6, window_bounds = array<i64: 1, 16>}, {transform_indices = @transform_7, window_bounds = array<i64: 8, 16>}]} {
    %c0 = arith.constant 0 : index
    %c0_0 = arith.constant 0 : index
    %0 = vector.load %arg1[%c0, %c0_0] : memref<8x128xf32, #tpu.memory_space<vmem>>, vector<8x128xf32>
    %1 = arith.truncf %0 : vector<8x128xf32> to vector<8x128xbf16>
    %c0_1 = arith.constant 0 : index
    %c0_2 = arith.constant 0 : index
    %2 = vector.load %arg2[%c0_1, %c0_2] : memref<128x64xbf16, #tpu.memory_space<vmem>>, vector<128x64xbf16>
    %cst = arith.constant dense<0.000000e+00> : vector<8x64xf32>
    %3 = tpu.matmul %1, %2, %cst {dimension_numbers = #tpu.dot_dimension_numbers<[1], [0], [0], [1], [0, 0, 1, 1], [], []>} : vector<8x128xbf16>, vector<128x64xbf16>, vector<8x64xf32> -> vector<8x64xf32>
    %c0_3 = arith.constant 0 : index
    %c0_4 = arith.constant 0 : index
    %4 = vector.load %arg3[%c0_3, %c0_4] : memref<1x64xf32, #tpu.memory_space<vmem>>, vector<1x64xf32>
    %5 = vector.broadcast %4 : vector<1x64xf32> to vector<8x64xf32>
    %6 = arith.addf %3, %5 : vector<8x64xf32>
    %cst_5 = arith.constant 0.000000e+00 : f32
    %7 = vector.broadcast %cst_5 : f32 to vector<8x64xf32>
    %8 = arith.maximumf %6, %7 : vector<8x64xf32>
    %9 = arith.truncf %8 : vector<8x64xf32> to vector<8x64xbf16>
    %c0_6 = arith.constant 0 : index
    %c0_7 = arith.constant 0 : index
    %10 = vector.load %arg4[%c0_6, %c0_7] : memref<64x32xbf16, #tpu.memory_space<vmem>>, vector<64x32xbf16>
    %cst_8 = arith.constant dense<0.000000e+00> : vector<8x32xf32>
    %11 = tpu.matmul %9, %10, %cst_8 {dimension_numbers = #tpu.dot_dimension_numbers<[1], [0], [0], [1], [0, 0, 1, 1], [], []>} : vector<8x64xbf16>, vector<64x32xbf16>, vector<8x32xf32> -> vector<8x32xf32>
    %c0_9 = arith.constant 0 : index
    %c0_10 = arith.constant 0 : index
    %12 = vector.load %arg5[%c0_9, %c0_10] : memref<1x32xf32, #tpu.memory_space<vmem>>, vector<1x32xf32>
    %13 = vector.broadcast %12 : vector<1x32xf32> to vector<8x32xf32>
    %14 = arith.addf %11, %13 : vector<8x32xf32>
    %cst_11 = arith.constant 0.000000e+00 : f32
    %15 = vector.broadcast %cst_11 : f32 to vector<8x32xf32>
    %16 = arith.maximumf %14, %15 : vector<8x32xf32>
    %17 = arith.truncf %16 : vector<8x32xf32> to vector<8x32xbf16>
    %c0_12 = arith.constant 0 : index
    %c0_13 = arith.constant 0 : index
    %18 = vector.load %arg6[%c0_12, %c0_13] : memref<32x16xbf16, #tpu.memory_space<vmem>>, vector<32x16xbf16>
    %cst_14 = arith.constant dense<0.000000e+00> : vector<8x16xf32>
    %19 = tpu.matmul %17, %18, %cst_14 {dimension_numbers = #tpu.dot_dimension_numbers<[1], [0], [0], [1], [0, 0, 1, 1], [], []>} : vector<8x32xbf16>, vector<32x16xbf16>, vector<8x16xf32> -> vector<8x16xf32>
    %c0_15 = arith.constant 0 : index
    %c0_16 = arith.constant 0 : index
    %20 = vector.load %arg7[%c0_15, %c0_16] : memref<1x16xf32, #tpu.memory_space<vmem>>, vector<1x16xf32>
    %21 = vector.broadcast %20 : vector<1x16xf32> to vector<8x16xf32>
    %22 = arith.addf %19, %21 : vector<8x16xf32>
    %cst_17 = arith.constant 0.000000e+00 : f32
    %23 = vector.broadcast %cst_17 : f32 to vector<8x16xf32>
    %24 = arith.maximumf %22, %23 : vector<8x16xf32>
    %c0_18 = arith.constant 0 : index
    %c0_19 = arith.constant 0 : index
    %25 = vector.load %arg8[%c0_18, %c0_19] : memref<8x16xf32, #tpu.memory_space<vmem>>, vector<8x16xf32>
    tpu.vector_store %arg8[%c0_18, %c0_19], %24 {strides = array<i32>} : memref<8x16xf32, #tpu.memory_space<vmem>>, vector<8x16xf32>,
    return
  }
  func.func @transform_0(%arg0: i32) -> (i32, i32) {
    %c0_i32 = arith.constant 0 : i32
    %c0_i32_0 = arith.constant 0 : i32
    return %arg0, %c0_i32 : i32, i32
  }
  func.func @transform_1(%arg0: i32) -> (i32, i32) {
    %c0_i32 = arith.constant 0 : i32
    %c0_i32_0 = arith.constant 0 : i32
    %c0_i32_1 = arith.constant 0 : i32
    return %c0_i32, %c0_i32_0 : i32, i32
  }
  func.func @transform_2(%arg0: i32) -> (i32, i32) {
    %c0_i32 = arith.constant 0 : i32
    %c0_i32_0 = arith.constant 0 : i32
    %c0_i32_1 = arith.constant 0 : i32
    return %c0_i32, %c0_i32_0 : i32, i32
  }
  func.func @transform_3(%arg0: i32) -> (i32, i32) {
    %c0_i32 = arith.constant 0 : i32
    %c0_i32_0 = arith.constant 0 : i32
    %c0_i32_1 = arith.constant 0 : i32
    return %c0_i32, %c0_i32_0 : i32, i32
  }
  func.func @transform_4(%arg0: i32) -> (i32, i32) {
    %c0_i32 = arith.constant 0 : i32
    %c0_i32_0 = arith.constant 0 : i32
    %c0_i32_1 = arith.constant 0 : i32
    return %c0_i32, %c0_i32_0 : i32, i32
  }
  func.func @transform_5(%arg0: i32) -> (i32, i32) {
    %c0_i32 = arith.constant 0 : i32
    %c0_i32_0 = arith.constant 0 : i32
    %c0_i32_1 = arith.constant 0 : i32
    return %c0_i32, %c0_i32_0 : i32, i32
  }
  func.func @transform_6(%arg0: i32) -> (i32, i32) {
    %c0_i32 = arith.constant 0 : i32
    %c0_i32_0 = arith.constant 0 : i32
    %c0_i32_1 = arith.constant 0 : i32
    return %c0_i32, %c0_i32_0 : i32, i32
  }
  func.func @transform_7(%arg0: i32) -> (i32, i32) {
    %c0_i32 = arith.constant 0 : i32
    %c0_i32_0 = arith.constant 0 : i32
    return %arg0, %c0_i32 : i32, i32
  }
}

</mosaic_0001>

<bundles_post_ra>
// kernel: tpu_custom_call.1
= control target key start
LH: loop header
LB: loop body
LE: loop exit
PB: predicated region body
PF: predicated region fallthrough
CT: control target
= control target key end

     0   :  { %12 = vsyncpa [#allocation3], 0  ;;  %s851_s0 = inlined_call_operand.hbm [shape: f32[8,128], index: 0, kind: input, shape index: {}]   ;;  %s852_s1 = inlined_call_operand.hbm [shape: bf16[128,64], index: 1, kind: input, shape index: {}]   ;;  %s853_s2 = inlined_call_operand.hbm [shape: f32[1,64], index: 2, kind: input, shape index: {}]   ;;  %s854_s3 = inlined_call_operand.hbm [shape: bf16[64,32], index: 3, kind: input, shape index: {}]   ;;  %s855_s4 = inlined_call_operand.hbm [shape: f32[1,32], index: 4, kind: input, shape index: {}]   ;;  %s856_s5 = inlined_call_operand.hbm [shape: bf16[32,16], index: 5, kind: input, shape index: {}]   ;;  %s857_s6 = inlined_call_operand.hbm [shape: f32[1,16], index: 6, kind: input, shape index: {}]   ;;  %s858_s7 = inlined_call_operand.hbm [shape: f32[8,16], index: 7, kind: output, shape index: {}]  }
   0x1   :  { %13 = vsyncpa [#allocation6], 0 }
   0x2   :  { %14 = vsyncpa [#allocation9], 0 }
   0x3   :  { %15 = vsyncpa [#allocation12], 0 }
   0x4   :  { %16 = vsyncpa [#allocation4], 0  ;;  %s691_s24 = smov [#allocation5]   ;;  %s505_s28 = scalar_lea.hbm %s852_s1, 1024 }
   0x5   :  { %s32_s25 = sshll.u32 %s691_s24, 4  ;;  %p506_p0 = scmp.ne.s32.totalorder %s852_s1, %s505_s28  ;;  %s33_s25 = int_to_ptr.vmem [resolvable:$true] %s32_s25 }
   0x6   :  { %p509_p1 = scmp.lt.u32.totalorder %s505_s28, %s852_s1 }
   0x8   :  { %p511_p2 = pnand %p509_p1, %p506_p0 }
   0xa   :  { %514 = shalt.err (!%p511_p2)
}
   0xb   :  { %s515_s10 = scalar_lea.vmem %s33_s25, 1024  ;;  %p520_p4 = scmp.lt.s32.totalorder %s33_s25, %s33_s25 }
   0xc   :  { %p516_p3 = scmp.ne.s32.totalorder %s33_s25, %s515_s10  ;;  %p521_p5 = scmp.lt.s32.totalorder %s515_s10, %s515_s10 }
   0xe   :  { %p522_p6 = por %p521_p5, %p520_p4 }
  0x10   :  { %p523_p7 = pnand %p522_p6, %p516_p3 }
  0x12   :  { %526 = shalt.err (!%p523_p7)
}
  0x13   :  { %s692_s11 = smov 64   ;;  %s693_s12 = smov 4  }
  0x14   :  { %38 = dma.hbm_to_vmem [thread:$0]  %s852_s1, 1024, %s33_s25, [#allocation6], %s692_s11, %s692_s11, %s693_s12  }
  0x15   :  { %s694_s15 = smov [#allocation8]   ;;  %s695_s17 = smov [#allocation11]  }
  0x16   :  { %s54_s16 = sshll.u32 %s694_s15, 4  ;;  %s76_s18 = sshll.u32 %s695_s17, 4  ;;  %s55_s16 = int_to_ptr.vmem [resolvable:$true] %s54_s16  ;;  %s77_s18 = int_to_ptr.vmem [resolvable:$true] %s76_s18 }
  0x17   :  { %s527_s21 = scalar_lea.hbm %s854_s3, 512 }
  0x18   :  { %p528_p8 = scmp.ne.s32.totalorder %s854_s3, %s527_s21  ;;  %p531_p9 = scmp.lt.u32.totalorder %s527_s21, %s854_s3 }
  0x1a   :  { %p533_p10 = pnand %p531_p9, %p528_p8 }
  0x1c   :  { %536 = shalt.err (!%p533_p10)
}
  0x1d   :  { %s537_s1 = scalar_lea.vmem %s55_s16, 512  ;;  %p542_p12 = scmp.lt.s32.totalorder %s55_s16, %s55_s16 }
  0x1e   :  { %p538_p11 = scmp.ne.s32.totalorder %s55_s16, %s537_s1  ;;  %p543_p13 = scmp.lt.s32.totalorder %s537_s1, %s537_s1 }
  0x20   :  { %p544_p0 = por %p543_p13, %p542_p12 }
  0x22   :  { %p545_p1 = pnand %p544_p0, %p538_p11 }
  0x24   :  { %548 = shalt.err (!%p545_p1)
}
  0x25   :  { %60 = dma.hbm_to_vmem [thread:$0]  %s854_s3, 512, %s55_s16, [#allocation9], %s692_s11, %s692_s11, %s693_s12  }
  0x26   :  { %s549_s30 = scalar_lea.hbm %s856_s5, 256 }
  0x27   :  { %p550_p2 = scmp.ne.s32.totalorder %s856_s5, %s549_s30  ;;  %p553_p3 = scmp.lt.u32.totalorder %s549_s30, %s856_s5 }
  0x29   :  { %p555_p4 = pnand %p553_p3, %p550_p2 }
  0x2b   :  { %558 = shalt.err (!%p555_p4)
}
  0x2c   :  { %s559_s14 = scalar_lea.vmem %s77_s18, 256  ;;  %p564_p6 = scmp.lt.s32.totalorder %s77_s18, %s77_s18 }
  0x2d   :  { %p560_p5 = scmp.ne.s32.totalorder %s77_s18, %s559_s14  ;;  %p565_p7 = scmp.lt.s32.totalorder %s559_s14, %s559_s14 }
  0x2f   :  { %p566_p8 = por %p565_p7, %p564_p6 }
  0x31   :  { %p567_p9 = pnand %p566_p8, %p560_p5 }
  0x33   :  { %570 = shalt.err (!%p567_p9)
}
  0x34   :  { %82 = dma.hbm_to_vmem [thread:$0]  %s856_s5, 256, %s77_s18, [#allocation12], %s692_s11, %s692_s11, %s693_s12  }
  0x35   :  { %s696_s16 = smov [#allocation2]   ;;  %s697_s19 = smov [#allocation7]  }
  0x36   :  { %s23_s17 = sshll.u32 %s696_s16, 4  ;;  %s45_s20 = sshll.u32 %s697_s19, 4  ;;  %s24_s17 = int_to_ptr.vmem [resolvable:$true] %s23_s17  ;;  %s46_s20 = int_to_ptr.vmem [resolvable:$true] %s45_s20 }
  0x37   :  { %s571_s23 = scalar_lea.hbm %s851_s0, 128 }
  0x38   :  { %p572_p10 = scmp.ne.s32.totalorder %s851_s0, %s571_s23  ;;  %p575_p11 = scmp.lt.u32.totalorder %s571_s23, %s851_s0 }
  0x3a   :  { %p577_p12 = pnand %p575_p11, %p572_p10 }
  0x3c   :  { %580 = shalt.err (!%p577_p12)
}
  0x3d   :  { %s581_s5 = scalar_lea.vmem %s24_s17, 128  ;;  %p586_p0 = scmp.lt.s32.totalorder %s24_s17, %s24_s17 }
  0x3e   :  { %p582_p13 = scmp.ne.s32.totalorder %s24_s17, %s581_s5  ;;  %p587_p1 = scmp.lt.s32.totalorder %s581_s5, %s581_s5 }
  0x40   :  { %p588_p2 = por %p587_p1, %p586_p0 }
  0x42   :  { %p589_p3 = pnand %p588_p2, %p582_p13 }
  0x44   :  { %592 = shalt.err (!%p589_p3)
}
  0x45   :  { %26 = dma.hbm_to_vmem [thread:$0]  %s851_s0, 128, %s24_s17, [#allocation3]  }
  0x46   :  { %s593_s28 = scalar_lea.hbm %s853_s2, 16 }
  0x47   :  { %p594_p4 = scmp.ne.s32.totalorder %s853_s2, %s593_s28  ;;  %p597_p5 = scmp.lt.u32.totalorder %s593_s28, %s853_s2 }
  0x49   :  { %p599_p6 = pnand %p597_p5, %p594_p4 }
  0x4b   :  { %602 = shalt.err (!%p599_p6)
}
  0x4c   :  { %s603_s10 = scalar_lea.vmem %s46_s20, 16  ;;  %s607_s13 = scalar_lea.vmem %s46_s20, 32 }
  0x4d   :  { %p604_p7 = scmp.ne.s32.totalorder %s46_s20, %s603_s10  ;;  %p608_p8 = scmp.lt.s32.totalorder %s46_s20, %s46_s20 }
  0x4e   :  { %p609_p9 = scmp.lt.s32.totalorder %s607_s13, %s603_s10 }
  0x50   :  { %p610_p10 = por %p609_p9, %p608_p8 }
  0x52   :  { %p611_p11 = pnand %p610_p10, %p604_p7 }
  0x54   :  { %614 = shalt.err (!%p611_p11)
}
  0x55   :  { %48 = dma.hbm_to_vmem [thread:$0]  %s853_s2, 16, %s46_s20, [#allocation6]  }
  0x56   :  { %s698_s3 = smov [#allocation10]   ;;  %s699_s16 = smov [#allocation13]  }
  0x57   :  { %s67_s15 = sshll.u32 %s698_s3, 4  ;;  %s89_s17 = sshll.u32 %s699_s16, 4  ;;  %s68_s15 = int_to_ptr.vmem [resolvable:$true] %s67_s15  ;;  %s90_s17 = int_to_ptr.vmem [resolvable:$true] %s89_s17 }
  0x58   :  { %s615_s22 = scalar_lea.hbm %s855_s4, 16 }
  0x59   :  { %p616_p12 = scmp.ne.s32.totalorder %s855_s4, %s615_s22  ;;  %p619_p13 = scmp.lt.u32.totalorder %s615_s22, %s855_s4 }
  0x5b   :  { %p621_p0 = pnand %p619_p13, %p616_p12 }
  0x5d   :  { %624 = shalt.err (!%p621_p0)
}
  0x5e   :  { %s625_s2 = scalar_lea.vmem %s68_s15, 16  ;;  %s629_s20 = scalar_lea.vmem %s68_s15, 32 }
  0x5f   :  { %p626_p1 = scmp.ne.s32.totalorder %s68_s15, %s625_s2  ;;  %p630_p2 = scmp.lt.s32.totalorder %s68_s15, %s68_s15 }
  0x60   :  { %p631_p3 = scmp.lt.s32.totalorder %s629_s20, %s625_s2 }
  0x62   :  { %p632_p4 = por %p631_p3, %p630_p2 }
  0x64   :  { %p633_p5 = pnand %p632_p4, %p626_p1 }
  0x66   :  { %636 = shalt.err (!%p633_p5)
}
  0x67   :  { %70 = dma.hbm_to_vmem [thread:$0]  %s855_s4, 16, %s68_s15, [#allocation9]  }
  0x68   :  { %s637_s18 = scalar_lea.hbm %s857_s6, 16 }
  0x69   :  { %p638_p6 = scmp.ne.s32.totalorder %s857_s6, %s637_s18  ;;  %p641_p7 = scmp.lt.u32.totalorder %s637_s18, %s857_s6 }
  0x6b   :  { %p643_p8 = pnand %p641_p7, %p638_p6 }
  0x6d   :  { %646 = shalt.err (!%p643_p8)
}
  0x6e   :  { %s647_s8 = scalar_lea.vmem %s90_s17, 16  ;;  %s651_s9 = scalar_lea.vmem %s90_s17, 32 }
  0x6f   :  { %p648_p9 = scmp.ne.s32.totalorder %s90_s17, %s647_s8  ;;  %p652_p10 = scmp.lt.s32.totalorder %s90_s17, %s90_s17 }
  0x70   :  { %p653_p11 = scmp.lt.s32.totalorder %s651_s9, %s647_s8 }
  0x72   :  { %p654_p12 = por %p653_p11, %p652_p10 }
  0x74   :  { %p655_p13 = pnand %p654_p12, %p648_p9 }
  0x76   :  { %658 = shalt.err (!%p655_p13)
}
  0x77   :  { %92 = dma.hbm_to_vmem [thread:$0]  %s857_s6, 16, %s90_s17, [#allocation12]  }
  0x78   :  { %681 = dma.done.wait [#allocation3], 128  }
  0x79   :  { %682 = vsyncadd [#allocation3], 4294967168 }
  0x7a   :  { %683 = dma.done.wait [#allocation6], 1040  }
  0x7b   :  { %684 = vsyncadd [#allocation6], 4294966256 }
  0x7c   :  { %685 = dma.done.wait [#allocation9], 528  }
  0x7d   :  { %686 = vsyncadd [#allocation9], 4294966768 }
  0x7e   :  { %687 = dma.done.wait [#allocation12], 272  }
  0x7f   :  { %688 = vsyncadd [#allocation12], 4294967024  ;;  %v700_v0 = vmov 0.0   ;;  %vm701_vm0 = vmmov 0   ;;  %v491_v1 = vld [vmem:[#allocation5] sm:$0xff]   ;;  %v492_v2 = vld [vmem:[#allocation5 + $0x8] sm:$0xff]  }
  0x80   :  { %439 = vmatprep.subr.bf16.mxu0 %v700_v0  ;;  %455 = vmatprep.mubr.msk.bf16.mxu0 %vm701_vm0, %v700_v0  ;;  %v493_v3 = vld [vmem:[#allocation5 + $0x10] sm:$0xff]   ;;  %v499_v4 = vld [vmem:[#allocation8] sm:$0xff]   ;;  %v494_v5 = vld [vmem:[#allocation5 + $0x18] sm:$0xff]   ;;  %vm269_vm1 = vcmask 523264   ;;  %vm338_vm2 = vcmask 261120   ;;  %s702_s6 = smov [#allocation14]  }
  0x81   :  { %459 = vmatprep.subr.bf16.mxu1 %v700_v0  ;;  %467 = vmatprep.mubr.msk.bf16.mxu1 %vm701_vm0, %v700_v0  ;;  %v500_v6 = vld [vmem:[#allocation8 + $0x8] sm:$0xff]   ;;  %v495_v7 = vld [vmem:[#allocation5 + $0x20] sm:$0xff]   ;;  %v498_v10 = vld [vmem:[#allocation5 + $0x38] sm:$0xff]   ;;  %s391_s13 = sshll.u32 %s702_s6, 4  ;;  %vm383_vm3 = vcmask 130048   ;;  %s392_s13 = int_to_ptr.vmem [resolvable:$true] %s391_s13 }
  0x82   :  { %440 = vmatpush3.bf16.msra.mxu0 %v491_v1  ;;  %460 = vmatpush3.bf16.msra.mxu1 %v499_v4  ;;  %v496_v8 = vld [vmem:[#allocation5 + $0x28] sm:$0xff]   ;;  %v497_v9 = vld [vmem:[#allocation5 + $0x30] sm:$0xff]   ;;  %v115_v11 = vld [vmem:[#allocation2] sm:$0xff]  ;;  %s659_s0 = scalar_lea.vmem %s392_s13, 128  ;;  %p664_p1 = scmp.lt.s32.totalorder %s392_s13, %s392_s13 }
  0x83   :  { %441 = vmatprep.subr.bf16.mxu0 %v700_v0  ;;  %461 = vmatprep.subr.bf16.mxu1 %v700_v0  ;;  %v116_v12 = vpack.c.bf16 %v115_v11, %v115_v11  ;;  %v501_v13 = vld [vmem:[#allocation8 + $0x10] sm:$0xff]   ;;  %v502_v14 = vld [vmem:[#allocation8 + $0x18] sm:$0xff]   ;;  %v503_v22 = vld [vmem:[#allocation11] sm:$0xff]   ;;  %p660_p0 = scmp.ne.s32.totalorder %s392_s13, %s659_s0  ;;  %p665_p2 = scmp.lt.s32.totalorder %s659_s0, %s659_s0 }
  0x84   :  { %v403_v15 = vld [vmem:[#allocation7] ss:$0 sm:$0xff]  ;;  %v504_v24 = vld [vmem:[#allocation11 + $0x8] sm:$0xff]   ;;  %v412_v25 = vld [vmem:[#allocation10] ss:$0 sm:$0xff] }
  0x85   :  { %v418_v33 = vld [vmem:[#allocation13] ss:$0 sm:$0xff]  ;;  %p666_p3 = por %p665_p2, %p664_p1 }
  0x86   :  { %442 = vmatpush3.bf16.msra.mxu0 %v492_v2  ;;  %462 = vmatpush3.bf16.msra.mxu1 %v500_v6 }
  0x87   :  { %443 = vmatprep.subr.bf16.mxu0 %v700_v0  ;;  %463 = vmatprep.subr.bf16.mxu1 %v700_v0  ;;  %p667_p4 = pnand %p666_p3, %p660_p0 }
  0x8a   :  { %444 = vmatpush3.bf16.msra.mxu0 %v493_v3  ;;  %464 = vmatpush3.bf16.msra.mxu1 %v501_v13 }
  0x8b   :  { %445 = vmatprep.subr.bf16.mxu0 %v700_v0  ;;  %465 = vmatprep.subr.bf16.mxu1 %v700_v0 }
  0x8e   :  { %446 = vmatpush3.bf16.msra.mxu0 %v494_v5  ;;  %466 = vmatpush3.bf16.msra.mxu1 %v502_v14 }
  0x8f   :  { %447 = vmatprep.subr.bf16.mxu0 %v700_v0  ;;  %471 = vmatprep.subr.bf16.mxu1 %v700_v0 }
  0x92   :  { %448 = vmatpush3.bf16.msra.mxu0 %v495_v7 }
  0x93   :  { %449 = vmatprep.subr.bf16.mxu0 %v700_v0 }
  0x96   :  { %450 = vmatpush3.bf16.msra.mxu0 %v496_v8 }
  0x97   :  { %451 = vmatprep.subr.bf16.mxu0 %v700_v0 }
  0x9a   :  { %452 = vmatpush3.bf16.msra.mxu0 %v497_v9 }
  0x9b   :  { %453 = vmatprep.subr.bf16.mxu0 %v700_v0 }
  0x9e   :  { %454 = vmatpush3.bf16.msra.mxu0 %v498_v10 }
  0xa1   :  { %456 = vmatmul.mubr.bf16.vlgmr.msra.gmra.mrb[0].mxu0 %v116_v12 }
 0x174   :  { %v222_v16 = vpop.f32.mrb[0].mxu0 }
 0x175   :  { %v223_v17 = vadd.f32 %v403_v15, %v222_v16  ;;  %v457_v18 = vpop.f32.mrb[1].mxu0 }
 0x176   :  { %v225_v19 = vpop.f32.mrb[2].mxu0 }
 0x177   :  { %v228_v20 = vmax.f32 %v223_v17, 0.0  ;;  %v458_v21 = vpop.f32.mrb[3].mxu0 }
 0x179   :  { %v229_v23 = vpack.c.bf16 %v228_v20, %v228_v20 }
 0x17b   :  { %468 = vmatmul.mubr.msk.bf16.vlgmr.msra.gmra.mrb[0].mxu1 %vm269_vm1, %v229_v23 }
 0x17c   :  { %472 = vmatpush3.bf16.msra.mxu1 %v503_v22  ;;  %475 = vmatprep.mubr.msk.bf16.mxu1 %vm701_vm0, %v700_v0 }
 0x17d   :  { %473 = vmatprep.subr.bf16.mxu1 %v700_v0 }
 0x180   :  { %474 = vmatpush3.bf16.msra.mxu1 %v504_v24 }
 0x24e   :  { %v307_v26 = vpop.f32.mrb[0].mxu1 }
 0x24f   :  { %v308_v27 = vadd.f32 %v412_v25, %v307_v26  ;;  %v469_v28 = vpop.f32.mrb[1].mxu1 }
 0x250   :  { %v310_v29 = vpop.f32.mrb[2].mxu1 }
 0x251   :  { %v313_v30 = vmax.f32 %v308_v27, 0.0  ;;  %v470_v31 = vpop.f32.mrb[3].mxu1 }
 0x253   :  { %v314_v32 = vpack.c.bf16 %v313_v30, %v313_v30 }
 0x255   :  { %476 = vmatmul.mubr.msk.bf16.vlgmr.msra.gmra.mrb[4].mxu1 %vm338_vm2, %v314_v32 }
 0x328   :  { %v376_v34 = vpop.f32.mrb[4].mxu1 }
 0x329   :  { %v377_v35 = vadd.f32 %v418_v33, %v376_v34  ;;  %v477_v36 = vpop.f32.mrb[5].mxu1 }
 0x32a   :  { %v379_v37 = vpop.f32.mrb[6].mxu1 }
 0x32b   :  { %v382_v38 = vmax.f32 %v377_v35, 0.0  ;;  %v478_v39 = vpop.f32.mrb[7].mxu1 }
 0x32d   :  { %384 = vst.msk [vmem:[#allocation14] sm:$0xff] %vm383_vm3, %v382_v38 }
 0x32e   :  { %670 = shalt.err (!%p667_p4)
}
 0x32f   :  { %s671_s15 = scalar_lea.hbm %s858_s7, 128 }
 0x330   :  { %p672_p5 = scmp.ne.s32.totalorder %s858_s7, %s671_s15  ;;  %p675_p6 = scmp.lt.u32.totalorder %s671_s15, %s858_s7 }
 0x332   :  { %p677_p7 = pnand %p675_p6, %p672_p5 }
 0x334   :  { %680 = shalt.err (!%p677_p7)
}
 0x335   :  { %394 = dma.vmem_to_hbm [thread:$0]  %s392_s13, 128, %s858_s7, [#allocation4]  }
 0x336   :  { %689 = dma.done.wait [#allocation4], 128  }
 0x337   :  { %690 = vsyncadd [#allocation4], 4294967168 }
 0x338   :  { %398 = vsyncpa [#allocation3], 1 }
 0x339   :  { %399 = vsyncpa [#allocation6], 1 }
 0x33a   :  { %400 = vsyncpa [#allocation9], 1 }
 0x33b   :  { %401 = vsyncpa [#allocation12], 1 }
 0x33c   :  { %402 = vsyncpa [#allocation4], 1 }

</bundles_post_ra>
